<compile_context>
chip_gen: v6e
topology: v6e:2x2x1
jax: 0.10.0
libtpu: 0.0.40
codegen_flags: <defaults>
</compile_context>

<pallas_src>
import functools

import jax
import jax.numpy as jnp
from jax.experimental import pallas as pl
from jax.experimental.pallas import tpu as pltpu

_LANE = 128
_SUBLANE = 8


def _round_up(x, m):
    return ((x + m - 1) // m) * m


def _vmem_budget_bytes(frac=0.75):
    """Generation-aware scoped-VMEM budget (v5e/v6e: 128 MiB physical, v7x: 64 MiB)."""
    try:
        cap = int(pltpu.get_tpu_info().vmem_capacity_bytes)
    except Exception:
        cap = 64 * 1024 * 1024  # conservative (v7x-sized) fallback
    return max(32 * 1024 * 1024, min(int(cap * frac), 112 * 1024 * 1024))


# ---------------------------------------------------------------------------
# Fully fused VMEM-resident kernel: all layers + Max/Avg readout in one call.
# ---------------------------------------------------------------------------
def _fused_gcn_pool_kernel(*refs, num_layers, compute_dtype):
    """refs = (adj01, d_inv_sqrt, x, w0, b0, ..., w_{L-1}, b_{L-1}, pool_out, x_out)."""
    adj_ref, d_ref, x_ref = refs[0], refs[1], refs[2]
    param_refs = refs[3:3 + 2 * num_layers]
    pool_ref, x_out_ref = refs[3 + 2 * num_layers:]

    adj = adj_ref[...]        # (N, N) raw 0/1 adjacency, compute_dtype (exact in bf16)
    d = d_ref[...]            # (N, 1) D^-1/2, f32
    h = x_ref[...]            # (N, F_in), compute_dtype

    for i in range(num_layers):
        w = param_refs[2 * i][...]          # (F_in_pad, F_out_pad), compute_dtype
        b = param_refs[2 * i + 1][...]      # (1, F_out_pad), f32
        xw = jnp.dot(h.astype(compute_dtype), w,
                     preferred_element_type=jnp.float32)           # MXU, f32 acc
        xw = (xw * d).astype(compute_dtype)                        # left D^-1/2 (VPU)
        h = jnp.dot(adj, xw, preferred_element_type=jnp.float32)   # MXU aggregation on 0/1 A
        h = h * d + b                                              # right D^-1/2 + bias (f32)
        if i + 1 < num_layers:
            h = jnp.maximum(h, 0.0)                                # ReLU on all but last layer

    x_out_ref[...] = h.astype(x_out_ref.dtype)

    # Fused readout: MaxPooling + AvgPooling over nodes, from the VMEM-resident h
    # (no second kernel, no re-read of X from HBM). Padded columns are exactly zero
    # through zero-padded W/b + ReLU, so they stay zero here and are sliced off outside.
    inv_n = 1.0 / h.shape[0]
    mx = jnp.max(h, axis=0, keepdims=True)
    avg = jnp.sum(h, axis=0, keepdims=True) * inv_n
    pool_ref[...] = (mx + avg).astype(pool_ref.dtype)


# ---------------------------------------------------------------------------
# Row-tiled large-N aggregation kernel: one (row_tile, N) stripe per grid step.
# ---------------------------------------------------------------------------
def _agg_row_tile_kernel(adj_ref, xw_ref, d_ref, b_ref, out_ref, *, apply_relu):
    agg = jnp.dot(adj_ref[...], xw_ref[...], preferred_element_type=jnp.float32)
    h = agg * d_ref[...] + b_ref[...]
    if apply_relu:
        h = jnp.maximum(h, 0.0)
    out_ref[...] = h.astype(out_ref.dtype)


def _aggregate_tiled(adj_c, xw_c, d, b_pad, *, apply_relu, row_tile, out_dtype, vmem_budget):
    n_pad = adj_c.shape[0]
    f_pad = xw_c.shape[1]
    cbytes = jnp.dtype(adj_c.dtype).itemsize
    grid = (n_pad // row_tile,)
    cost = pl.CostEstimate(
        flops=2 * n_pad * n_pad * f_pad,
        transcendentals=0,
        bytes_accessed=(n_pad * n_pad * cbytes + n_pad * f_pad * cbytes
                        + n_pad * f_pad * jnp.dtype(out_dtype).itemsize
                        + n_pad * 4 + f_pad * 4))
    return pl.pallas_call(
        functools.partial(_agg_row_tile_kernel, apply_relu=apply_relu),
        out_shape=jax.ShapeDtypeStruct((n_pad, f_pad), out_dtype),
        grid_spec=pltpu.PrefetchScalarGridSpec(
            num_scalar_prefetch=0,
            grid=grid,
            in_specs=[
                pl.BlockSpec((row_tile, n_pad), lambda r: (r, 0)),  # streamed A stripes
                pl.BlockSpec((n_pad, f_pad), lambda r: (0, 0)),     # hoisted X@W, VMEM-resident
                pl.BlockSpec((row_tile, 1), lambda r: (r, 0)),      # D^-1/2 row slice
                pl.BlockSpec((1, f_pad), lambda r: (0, 0)),         # bias
            ],
            out_specs=pl.BlockSpec((row_tile, f_pad), lambda r: (r, 0))),
        compiler_params=pltpu.CompilerParams(
            dimension_semantics=("parallel",),   # v7x: shard row stripes across both TCs
            vmem_limit_bytes=vmem_budget),
        cost_estimate=cost,
    )(adj_c, xw_c, d, b_pad)


# ---------------------------------------------------------------------------
# Parameter preparation (hoisted out of the forward; call once per model).
# ---------------------------------------------------------------------------
def prepare_gcn_params(params, input_size, compute_dtype=jnp.float32):
    """Zero-pad each layer's output dim to a lane multiple (128) and cast weights to
    compute_dtype ONCE. Padded columns stay exactly zero through bias/ReLU/aggregation."""
    padded = []
    in_dim = input_size
    for (w, b) in params:
        f_in_i, f_out_i = w.shape
        assert f_in_i <= in_dim
        out_pad = _round_up(f_out_i, _LANE)
        w_p = jnp.zeros((in_dim, out_pad), compute_dtype).at[:f_in_i, :f_out_i].set(
            w.astype(compute_dtype))
        b_p = jnp.zeros((1, out_pad), jnp.float32).at[0, :f_out_i].set(
            b.astype(jnp.float32))
        padded.append((w_p, b_p))
        in_dim = out_pad
    return tuple(padded)


# ---------------------------------------------------------------------------
# Forward pass.
# ---------------------------------------------------------------------------
@functools.partial(jax.jit,
                   static_argnames=("f_out_true", "compute_dtype", "force_tiled", "row_tile"))
def unsupervised_gcn_forward(adj01, deg, features, padded_params, *,
                             f_out_true, compute_dtype=jnp.float32,
                             force_tiled=False, row_tile=256):
    """adj01: dense 0/1 adjacency (N, N); deg: (N,) degrees.  Returns (pool_x, x)."""
    n = features.shape[0]
    f_in = features.shape[1]
    num_layers = len(padded_params)
    f_pad_last = padded_params[-1][0].shape[1]
    f_pad_max = max(w.shape[1] for (w, _) in padded_params)
    cbytes = jnp.dtype(compute_dtype).itemsize

    d_inv_sqrt = (1.0 / jnp.sqrt(jnp.maximum(deg, 1.0).astype(jnp.float32)))[:, None]
    adj_c = adj01.astype(compute_dtype)   # 0/1 entries are exact in bf16
    x_c = features.astype(compute_dtype)  # cast at the boundary: no in-kernel dup copies

    vmem_budget = _vmem_budget_bytes()

    # Rough footprint of the whole-array fused path (with slack for f32 intermediates).
    est = (n * n * cbytes + n * f_in * cbytes + n * 4
           + sum(w.size * cbytes + b.size * 4 for (w, b) in padded_params)
           + 3 * n * f_pad_max * 4 + f_pad_last * 4)
    est = int(est * 1.5)

    if (not force_tiled) and est <= vmem_budget:
        # ---- fully fused path: both layers + readout in ONE kernel, zero HBM round trips.
        flat = []
        flops = 0
        in_dim = f_in
        for (w_p, b_p) in padded_params:
            flat += [w_p, b_p]
            flops += 2 * n * in_dim * w_p.shape[1] + 2 * n * n * w_p.shape[1]
            in_dim = w_p.shape[1]
        bytes_accessed = (n * n * cbytes + n * f_in * cbytes + n * 4
                          + sum(w.size * cbytes + b.size * 4 for (w, b) in padded_params)
                          + n * f_pad_last * cbytes + f_pad_last * 4)
        kernel = functools.partial(_fused_gcn_pool_kernel,
                                   num_layers=num_layers, compute_dtype=compute_dtype)
        pool_p, x_p = pl.pallas_call(
            kernel,
            out_shape=(jax.ShapeDtypeStruct((1, f_pad_last), jnp.float32),
                       jax.ShapeDtypeStruct((n, f_pad_last), compute_dtype)),
            compiler_params=pltpu.CompilerParams(vmem_limit_bytes=vmem_budget),
            cost_estimate=pl.CostEstimate(flops=flops, transcendentals=0,
                                          bytes_accessed=bytes_accessed),
        )(adj_c, d_inv_sqrt, x_c, *flat)
        # NOTE: slicing off the zero lane-padding; consumers that tolerate the padded
        # layout could skip this to avoid the extra read+write.
        return pool_p[:, :f_out_true], x_p[:, :f_out_true]

    # ---- row-tiled large-N path: stream (row_tile, N) adjacency stripes through a
    #      pipelined 'parallel' grid; X@W is hoisted (computed once per layer).
    n8 = _round_up(n, _SUBLANE)
    resident = n8 * f_pad_max * cbytes + f_pad_max * 4                 # hoisted XW + bias
    per_row = 2 * n8 * cbytes + 2 * f_pad_max * (cbytes + 4)           # dbl-buffered A + out
    tm_cap = max(_SUBLANE, int((vmem_budget * 0.6 - resident) // max(per_row, 1)))
    tm = min(row_tile, n, tm_cap)
    row_tile = max(_SUBLANE, (tm // _SUBLANE) * _SUBLANE)
    n_pad = _round_up(n, row_tile)

    if n_pad == n:
        adj_p, d_p = adj_c, d_inv_sqrt
        h = features.astype(jnp.float32)
    else:
        adj_p = jnp.zeros((n_pad, n_pad), compute_dtype).at[:n, :n].set(adj_c)
        d_p = jnp.zeros((n_pad, 1), jnp.float32).at[:n].set(d_inv_sqrt)
        h = jnp.zeros((n_pad, f_in), jnp.float32).at[:n].set(features.astype(jnp.float32))

    for i, (w_p, b_p) in enumerate(padded_params):
        is_last = (i + 1 == num_layers)
        # Hoisted X @ W with the left D^-1/2 folded in (computed once per layer by XLA).
        xw = jnp.dot((h * d_p).astype(compute_dtype), w_p,
                     preferred_element_type=jnp.float32).astype(compute_dtype)
        h = _aggregate_tiled(adj_p, xw, d_p, b_p,
                             apply_relu=not is_last, row_tile=row_tile,
                             out_dtype=compute_dtype, vmem_budget=vmem_budget)
        if not is_last:
            h = h.astype(jnp.float32)

    x_out = h[:n, :f_out_true]
    # Readout over true nodes only (padded rows excluded -> max/avg exact; avg uses true N).
    x_f32 = x_out.astype(jnp.float32)
    pool = (jnp.max(x_f32, axis=0, keepdims=True)
            + jnp.mean(x_f32, axis=0, keepdims=True))
    return pool, x_out


# ---------------------------------------------------------------------------
# Pure-JAX reference (module semantics, independent of the kernel's folded form).
# ---------------------------------------------------------------------------
def _reference(adj_norm, features, params):
    x = features
    for i, (w, b) in enumerate(params):
        x = adj_norm @ (x @ w) + b[None, :]
        if (i + 1) < len(params):
            x = jnp.maximum(x, 0.0)
    pool = jnp.max(x, axis=0, keepdims=True) + jnp.mean(x, axis=0, keepdims=True)
    return pool, x


if __name__ == "__main__":
    # Small shapes consistent with the module: N nodes, input_size, hidden_size, output_size.
    N, F_IN, HID, OUT = 16, 32, 16, 16

    key = jax.random.PRNGKey(0)
    k_adj, k_x, k_w0, k_w1 = jax.random.split(key, 4)

    # Deterministic random undirected graph (dense 0/1 adjacency, no self loops).
    upper = jnp.triu(jax.random.bernoulli(k_adj, 0.3, (N, N)).astype(jnp.float32), k=1)
    adj01 = upper + upper.T
    deg = jnp.sum(adj01, axis=1)

    # Reference normalization (D^-1/2 A D^-1/2 with degree clamp, norm='both').
    d_inv_sqrt = jnp.maximum(deg, 1.0) ** -0.5
    adj_norm = d_inv_sqrt[:, None] * adj01 * d_inv_sqrt[None, :]

    # Node features and GraphConv parameters (deterministic init; DGL bias init = zeros).
    features = jax.random.normal(k_x, (N, F_IN), dtype=jnp.float32)
    w0 = jax.random.normal(k_w0, (F_IN, HID), dtype=jnp.float32) * 0.1
    b0 = jnp.zeros((HID,), dtype=jnp.float32)
    w1 = jax.random.normal(k_w1, (HID, OUT), dtype=jnp.float32) * 0.1
    b1 = jnp.zeros((OUT,), dtype=jnp.float32)
    params = [(w0, b0), (w1, b1)]

    pool_ref, x_ref_out = _reference(adj_norm, features, params)

    # f32 compute path, fully fused whole-array kernel (exact module semantics).
    padded_f32 = prepare_gcn_params(params, F_IN, compute_dtype=jnp.float32)
    pool_x, x_out = unsupervised_gcn_forward(adj01, deg, features, padded_f32,
                                             f_out_true=OUT, compute_dtype=jnp.float32)
    pool_x = jax.block_until_ready(pool_x)
    x_out = jax.block_until_ready(x_out)
    assert pool_x.shape == (1, OUT) and x_out.shape == (N, OUT)
    assert jnp.allclose(pool_x, pool_ref, atol=1e-4, rtol=1e-4)
    assert jnp.allclose(x_out, x_ref_out, atol=1e-4, rtol=1e-4)

    # Row-tiled large-N path (forced with a small row tile to exercise it here), f32.
    pool_t, x_t = unsupervised_gcn_forward(adj01, deg, features, padded_f32,
                                           f_out_true=OUT, compute_dtype=jnp.float32,
                                           force_tiled=True, row_tile=8)
    pool_t = jax.block_until_ready(pool_t)
    x_t = jax.block_until_ready(x_t)
    assert pool_t.shape == (1, OUT) and x_t.shape == (N, OUT)
    assert jnp.allclose(pool_t, pool_ref, atol=1e-4, rtol=1e-4)
    assert jnp.allclose(x_t, x_ref_out, atol=1e-4, rtol=1e-4)

    # bf16 MXU inputs / f32 accumulation (0/1 adjacency is exact in bf16) — looser tolerance.
    padded_bf16 = prepare_gcn_params(params, F_IN, compute_dtype=jnp.bfloat16)
    pool_bf, x_bf = unsupervised_gcn_forward(adj01, deg, features, padded_bf16,
                                             f_out_true=OUT, compute_dtype=jnp.bfloat16)
    pool_bf = jax.block_until_ready(pool_bf)
    x_bf = jax.block_until_ready(x_bf)
    assert jnp.allclose(pool_bf.astype(jnp.float32), pool_ref, atol=2e-2, rtol=5e-2)
    assert jnp.allclose(x_bf.astype(jnp.float32), x_ref_out, atol=2e-2, rtol=5e-2)

    print("KERNEL_OK")
</pallas_src>

<mosaic_0001>
module attributes {stable_mosaic.version = 11 : i64} {
  func.func @_fused_gcn_pool_kernel(%arg0: memref<16x16xf32, #tpu.memory_space<vmem>>, %arg1: memref<16x1xf32, #tpu.memory_space<vmem>>, %arg2: memref<16x32xf32, #tpu.memory_space<vmem>>, %arg3: memref<32x128xf32, #tpu.memory_space<vmem>>, %arg4: memref<1x128xf32, #tpu.memory_space<vmem>>, %arg5: memref<128x128xf32, #tpu.memory_space<vmem>>, %arg6: memref<1x128xf32, #tpu.memory_space<vmem>>, %arg7: memref<1x128xf32, #tpu.memory_space<vmem>>, %arg8: memref<16x128xf32, #tpu.memory_space<vmem>>) attributes {dimension_semantics = [], scalar_prefetch = 0 : i64, scratch_operands = 0 : i64, tpu.core_type = #tpu.core_type<tc>} {
    %c0 = arith.constant 0 : index
    %c0_0 = arith.constant 0 : index
    %0 = vector.load %arg0[%c0, %c0_0] : memref<16x16xf32, #tpu.memory_space<vmem>>, vector<16x16xf32>
    %c0_1 = arith.constant 0 : index
    %c0_2 = arith.constant 0 : index
    %1 = vector.load %arg1[%c0_1, %c0_2] : memref<16x1xf32, #tpu.memory_space<vmem>>, vector<16x1xf32>
    %c0_3 = arith.constant 0 : index
    %c0_4 = arith.constant 0 : index
    %2 = vector.load %arg2[%c0_3, %c0_4] : memref<16x32xf32, #tpu.memory_space<vmem>>, vector<16x32xf32>
    %c0_5 = arith.constant 0 : index
    %c0_6 = arith.constant 0 : index
    %3 = vector.load %arg3[%c0_5, %c0_6] : memref<32x128xf32, #tpu.memory_space<vmem>>, vector<32x128xf32>
    %c0_7 = arith.constant 0 : index
    %c0_8 = arith.constant 0 : index
    %4 = vector.load %arg4[%c0_7, %c0_8] : memref<1x128xf32, #tpu.memory_space<vmem>>, vector<1x128xf32>
    %cst = arith.constant dense<0.000000e+00> : vector<16x128xf32>
    %5 = tpu.matmul %2, %3, %cst {dimension_numbers = #tpu.dot_dimension_numbers<[1], [0], [0], [1], [0, 0, 1, 1], [], []>} : vector<16x32xf32>, vector<32x128xf32>, vector<16x128xf32> -> vector<16x128xf32>
    %6 = vector.broadcast %1 : vector<16x1xf32> to vector<16x128xf32>
    %7 = arith.mulf %5, %6 : vector<16x128xf32>
    %cst_9 = arith.constant dense<0.000000e+00> : vector<16x128xf32>
    %8 = tpu.matmul %0, %7, %cst_9 {dimension_numbers = #tpu.dot_dimension_numbers<[1], [0], [0], [1], [0, 0, 1, 1], [], []>} : vector<16x16xf32>, vector<16x128xf32>, vector<16x128xf32> -> vector<16x128xf32>
    %9 = vector.broadcast %1 : vector<16x1xf32> to vector<16x128xf32>
    %10 = arith.mulf %8, %9 : vector<16x128xf32>
    %11 = vector.broadcast %4 : vector<1x128xf32> to vector<16x128xf32>
    %12 = arith.addf %10, %11 : vector<16x128xf32>
    %cst_10 = arith.constant 0.000000e+00 : f32
    %13 = vector.broadcast %cst_10 : f32 to vector<16x128xf32>
    %14 = arith.maximumf %12, %13 : vector<16x128xf32>
    %c0_11 = arith.constant 0 : index
    %c0_12 = arith.constant 0 : index
    %15 = vector.load %arg5[%c0_11, %c0_12] : memref<128x128xf32, #tpu.memory_space<vmem>>, vector<128x128xf32>
    %c0_13 = arith.constant 0 : index
    %c0_14 = arith.constant 0 : index
    %16 = vector.load %arg6[%c0_13, %c0_14] : memref<1x128xf32, #tpu.memory_space<vmem>>, vector<1x128xf32>
    %cst_15 = arith.constant dense<0.000000e+00> : vector<16x128xf32>
    %17 = tpu.matmul %14, %15, %cst_15 {dimension_numbers = #tpu.dot_dimension_numbers<[1], [0], [0], [1], [0, 0, 1, 1], [], []>} : vector<16x128xf32>, vector<128x128xf32>, vector<16x128xf32> -> vector<16x128xf32>
    %18 = vector.broadcast %1 : vector<16x1xf32> to vector<16x128xf32>
    %19 = arith.mulf %17, %18 : vector<16x128xf32>
    %cst_16 = arith.constant dense<0.000000e+00> : vector<16x128xf32>
    %20 = tpu.matmul %0, %19, %cst_16 {dimension_numbers = #tpu.dot_dimension_numbers<[1], [0], [0], [1], [0, 0, 1, 1], [], []>} : vector<16x16xf32>, vector<16x128xf32>, vector<16x128xf32> -> vector<16x128xf32>
    %21 = vector.broadcast %1 : vector<16x1xf32> to vector<16x128xf32>
    %22 = arith.mulf %20, %21 : vector<16x128xf32>
    %23 = vector.broadcast %16 : vector<1x128xf32> to vector<16x128xf32>
    %24 = arith.addf %22, %23 : vector<16x128xf32>
    %c0_17 = arith.constant 0 : index
    %c0_18 = arith.constant 0 : index
    %25 = vector.load %arg8[%c0_17, %c0_18] : memref<16x128xf32, #tpu.memory_space<vmem>>, vector<16x128xf32>
    tpu.vector_store %arg8[%c0_17, %c0_18], %24 {strides = array<i32>} : memref<16x128xf32, #tpu.memory_space<vmem>>, vector<16x128xf32>,
    %cst_19 = arith.constant dense<0xFF800000> : vector<128xf32>
    %26 = vector.multi_reduction <maximumf>, %24, %cst_19 [0] : vector<16x128xf32> to vector<128xf32>
    %27 = vector.shape_cast %26 : vector<128xf32> to vector<1x128xf32>
    %cst_20 = arith.constant dense<0.000000e+00> : vector<128xf32>
    %28 = vector.multi_reduction <add>, %24, %cst_20 [0] : vector<16x128xf32> to vector<128xf32>
    %29 = vector.shape_cast %28 : vector<128xf32> to vector<1x128xf32>
    %cst_21 = arith.constant 6.250000e-02 : f32
    %30 = vector.broadcast %cst_21 : f32 to vector<1x128xf32>
    %31 = arith.mulf %29, %30 : vector<1x128xf32>
    %32 = arith.addf %27, %31 : vector<1x128xf32>
    %c0_22 = arith.constant 0 : index
    %c0_23 = arith.constant 0 : index
    %33 = vector.load %arg7[%c0_22, %c0_23] : memref<1x128xf32, #tpu.memory_space<vmem>>, vector<1x128xf32>
    tpu.vector_store %arg7[%c0_22, %c0_23], %32 {strides = array<i32>} : memref<1x128xf32, #tpu.memory_space<vmem>>, vector<1x128xf32>,
    return
  }
}

</mosaic_0001>

<bundles_post_ra>
// kernel: unsupervised_gcn_forward.1
= control target key start
LH: loop header
LB: loop body
LE: loop exit
PB: predicated region body
PF: predicated region fallthrough
CT: control target
= control target key end

     0   :  { %14 = vsyncpa [#allocation3], 0  ;;  %s821_s0 = inlined_call_operand.vmem [shape: f32[16,16], index: 0, kind: input, shape index: {}]   ;;  %s822_s1 = inlined_call_operand.vmem [shape: f32[16,1], index: 1, kind: input, shape index: {}]   ;;  %s823_s2 = inlined_call_operand.hbm [shape: f32[16,32], index: 2, kind: input, shape index: {}]   ;;  %s824_s3 = inlined_call_operand.hbm [shape: f32[32,128], index: 3, kind: input, shape index: {}]   ;;  %s825_s4 = inlined_call_operand.vmem [shape: f32[1,128], index: 4, kind: input, shape index: {}]   ;;  %s826_s5 = inlined_call_operand.hbm [shape: f32[128,128], index: 5, kind: input, shape index: {}]   ;;  %s827_s6 = inlined_call_operand.vmem [shape: f32[1,128], index: 6, kind: input, shape index: {}]   ;;  %s828_s7 = inlined_call_operand.hbm [shape: f32[1,128], index: 7, kind: output, shape index: {0}]   ;;  %s829_s8 = inlined_call_operand.hbm [shape: f32[16,128], index: 8, kind: output, shape index: {1}]  }
   0x1   :  { %15 = vsyncpa [#allocation6], 0 }
   0x2   :  { %16 = vsyncpa [#allocation4], 0 }
   0x3   :  { %17 = vsyncpa [#allocation10], 0  ;;  %s717_s27 = smov [#allocation5]   ;;  %s718_s29 = smov [#allocation2]  }
   0x4   :  { %s39_s28 = sshll.u32 %s717_s27, 4  ;;  %s27_s30 = sshll.u32 %s718_s29, 4  ;;  %s40_s28 = int_to_ptr.vmem [resolvable:$true] %s39_s28  ;;  %s28_s30 = int_to_ptr.vmem [resolvable:$true] %s27_s30 }
   0x5   :  { %s617_s9 = scalar_lea.vmem %s40_s28, 512  ;;  %p622_p1 = scmp.lt.s32.totalorder %s40_s28, %s40_s28 }
   0x6   :  { %p618_p0 = scmp.ne.s32.totalorder %s40_s28, %s617_s9  ;;  %p623_p2 = scmp.lt.s32.totalorder %s617_s9, %s617_s9 }
   0x8   :  { %p624_p3 = por %p623_p2, %p622_p1 }
   0xa   :  { %p625_p4 = pnand %p624_p3, %p618_p0 }
   0xc   :  { %628 = shalt.err (!%p625_p4)
}
   0xd   :  { %s719_s10 = smov 128   ;;  %s720_s11 = smov 8  }
   0xe   :  { %45 = dma.hbm_to_vmem [thread:$0]  %s824_s3, 512, %s40_s28, [#allocation6], %s719_s10, %s719_s10, %s720_s11  }
   0xf   :  { %s637_s14 = scalar_lea.vmem %s28_s30, 256  ;;  %p642_p6 = scmp.lt.s32.totalorder %s28_s30, %s28_s30 }
  0x10   :  { %p638_p5 = scmp.ne.s32.totalorder %s28_s30, %s637_s14  ;;  %p643_p7 = scmp.lt.s32.totalorder %s637_s14, %s637_s14 }
  0x12   :  { %p644_p8 = por %p643_p7, %p642_p6 }
  0x14   :  { %p645_p9 = pnand %p644_p8, %p638_p5 }
  0x16   :  { %648 = shalt.err (!%p645_p9)
}
  0x17   :  { %33 = dma.hbm_to_vmem [thread:$0]  %s823_s2, 256, %s28_s30, [#allocation3], %s719_s10, %s719_s10, %s720_s11  }
  0x18   :  { %s721_s17 = smov [#allocation7]  }
  0x19   :  { %s53_s18 = sshll.u32 %s721_s17, 4  ;;  %s54_s18 = int_to_ptr.vmem [resolvable:$true] %s53_s18 }
  0x1a   :  { %s657_s19 = scalar_lea.vmem %s54_s18, 2048  ;;  %p662_p11 = scmp.lt.s32.totalorder %s54_s18, %s54_s18 }
  0x1b   :  { %p658_p10 = scmp.ne.s32.totalorder %s54_s18, %s657_s19  ;;  %p663_p12 = scmp.lt.s32.totalorder %s657_s19, %s657_s19 }
  0x1d   :  { %p664_p13 = por %p663_p12, %p662_p11 }
  0x1f   :  { %p665_p0 = pnand %p664_p13, %p658_p10 }
  0x21   :  { %668 = shalt.err (!%p665_p0)
}
  0x22   :  { %59 = dma.hbm_to_vmem [thread:$0]  %s826_s5, 2048, %s54_s18, [#allocation6], %s719_s10, %s719_s10, %s720_s11  }
  0x23   :  { %709 = dma.done.wait [#allocation3], 256  }
  0x24   :  { %710 = vsyncadd [#allocation3], 4294967040 }
  0x25   :  { %711 = dma.done.wait [#allocation6], 2560  }
  0x26   :  { %712 = vsyncadd [#allocation6], 4294964736  ;;  %v722_v0 = vmov 0   ;;  %vm82_vm0 = vcmask 261120   ;;  %v80_v1 = vld [vmem:[#allocation5 + $0x18] sm:$0xff]  ;;  %v79_v2 = vld [vmem:[#allocation5 + $0x10] sm:$0xff] }
  0x27   :  { %608 = vset.pattern.permute.xlu0 %v722_v0  ;;  %540 = vmatprep.subr.mxu0 %v80_v1  ;;  %v75_v3 = vld [vmem:[#allocation2] sm:$0xff]  ;;  %v78_v4 = vld [vmem:[#allocation5 + $0x8] sm:$0xff]  ;;  %v74_v5 = vld [vmem:[%s822_s1 + $0x8] sm:$0xff]  ;;  %vm176_vm1 = vcmask 130048   ;;  %s723_s28 = smov [#allocation9]  }
  0x28   :  { %541 = vmatpush3.msra.mxu0 %v80_v1  ;;  %548 = vmatprep.mubr.msk.f32.mxu0 %vm82_vm0, %v75_v3  ;;  %v77_v6 = vld [vmem:[#allocation5] sm:$0xff]  ;;  %v73_v7 = vld [vmem:[%s822_s1] sm:$0xff]  ;;  %v76_v8 = vld [vmem:[#allocation2 + $0x8] sm:$0xff]  ;;  %s483_s29 = sshll.u32 %s723_s28, 4  ;;  %s484_s29 = int_to_ptr.vmem [resolvable:$true] %s483_s29 }
  0x29   :  { %542 = vmatprep.subr.mxu0 %v79_v2  ;;  %171 = vperm.xlu0 %608, %v74_v5   ;;  %v71_v9 = vld [vmem:[%s821_s0] sm:$0xff]  ;;  %v285_v10 = vld [vmem:[#allocation7 + $0x78] sm:$0xff]  ;;  %v283_v12 = vld [vmem:[#allocation7 + $0x68] sm:$0xff]  ;;  %s669_s30 = scalar_lea.vmem %s484_s29, 256  ;;  %p674_p2 = scmp.lt.s32.totalorder %s484_s29, %s484_s29 }
  0x2a   :  { %543 = vmatpush3.msra.mxu0 %v79_v2  ;;  %v284_v11 = vld [vmem:[#allocation7 + $0x70] sm:$0xff]  ;;  %558 = vmatprep.subr.mxu1 %v285_v10  ;;  %v282_v13 = vld [vmem:[#allocation7 + $0x60] sm:$0xff]  ;;  %v281_v14 = vld [vmem:[#allocation7 + $0x58] sm:$0xff]  ;;  %p670_p1 = scmp.ne.s32.totalorder %s484_s29, %s669_s30  ;;  %p675_p3 = scmp.lt.s32.totalorder %s669_s30, %s669_s30 }
  0x2b   :  { %544 = vmatprep.subr.mxu0 %v78_v4  ;;  %559 = vmatpush3.msra.mxu1 %v285_v10  ;;  %v280_v15 = vld [vmem:[#allocation7 + $0x50] sm:$0xff]  ;;  %v279_v16 = vld [vmem:[#allocation7 + $0x48] sm:$0xff]  ;;  %v278_v17 = vld [vmem:[#allocation7 + $0x40] sm:$0xff] }
  0x2c   :  { %545 = vmatpush3.msra.mxu0 %v78_v4  ;;  %560 = vmatprep.subr.mxu1 %v284_v11  ;;  %v277_v18 = vld [vmem:[#allocation7 + $0x38] sm:$0xff]  ;;  %v276_v19 = vld [vmem:[#allocation7 + $0x30] sm:$0xff]  ;;  %v275_v20 = vld [vmem:[#allocation7 + $0x28] sm:$0xff]  ;;  %p676_p4 = por %p675_p3, %p674_p2 }
  0x2d   :  { %546 = vmatprep.subr.mxu0 %v77_v6  ;;  %166 = vperm.xlu0 %608, %v73_v7   ;;  %v72_v27 = vld [vmem:[%s821_s0 + $0x8] sm:$0xff]  ;;  %v274_v28 = vld [vmem:[#allocation7 + $0x20] sm:$0xff]  ;;  %v272_v30 = vld [vmem:[#allocation7 + $0x10] sm:$0xff] }
  0x2e   :  { %547 = vmatpush3.msra.mxu0 %v77_v6  ;;  %561 = vmatpush3.msra.mxu1 %v284_v11  ;;  %v273_v29 = vld [vmem:[#allocation7 + $0x18] sm:$0xff]  ;;  %v271_v31 = vld [vmem:[#allocation7 + $0x8] sm:$0xff]  ;;  %v270_v32 = vld [vmem:[#allocation7] sm:$0xff]  ;;  %p677_p5 = pnand %p676_p4, %p670_p1 }
  0x2f   :  { %549 = vmatmul.mubr.msk.f32.vlgmr.msra.gmra.mxu0 %vm82_vm0, %v76_v8  ;;  %562 = vmatprep.subr.mxu1 %v283_v12  ;;  %v504_v35 = vld [vmem:[%s825_s4] ss:$0 sm:$0xff] }
  0x30   :  { %555 = vmatprep.mubr.msk.f32.mxu0 %vm176_vm1, %v71_v9  ;;  %563 = vmatpush3.msra.mxu1 %v283_v12  ;;  %v507_v46 = vld [vmem:[%s827_s6] ss:$0 sm:$0xff] }
  0x31   :  { %564 = vmatprep.subr.mxu1 %v282_v13 }
  0x32   :  { %565 = vmatpush3.msra.mxu1 %v282_v13 }
  0x33   :  { %566 = vmatprep.subr.mxu1 %v281_v14 }
  0x34   :  { %567 = vmatpush3.msra.mxu1 %v281_v14 }
  0x35   :  { %568 = vmatprep.subr.mxu1 %v280_v15 }
  0x36   :  { %569 = vmatpush3.msra.mxu1 %v280_v15 }
  0x37   :  { %570 = vmatprep.subr.mxu1 %v279_v16 }
  0x38   :  { %571 = vmatpush3.msra.mxu1 %v279_v16 }
  0x39   :  { %572 = vmatprep.subr.mxu1 %v278_v17 }
  0x3a   :  { %573 = vmatpush3.msra.mxu1 %v278_v17 }
  0x3b   :  { %574 = vmatprep.subr.mxu1 %v277_v18 }
  0x3c   :  { %575 = vmatpush3.msra.mxu1 %v277_v18 }
  0x3d   :  { %576 = vmatprep.subr.mxu1 %v276_v19 }
  0x3e   :  { %577 = vmatpush3.msra.mxu1 %v276_v19 }
  0x3f   :  { %578 = vmatprep.subr.mxu1 %v275_v20 }
  0x40   :  { %579 = vmatpush3.msra.mxu1 %v275_v20 }
  0x41   :  { %580 = vmatprep.subr.mxu1 %v274_v28 }
  0x42   :  { %581 = vmatpush3.msra.mxu1 %v274_v28 }
  0x43   :  { %582 = vmatprep.subr.mxu1 %v273_v29 }
  0x44   :  { %583 = vmatpush3.msra.mxu1 %v273_v29 }
  0x45   :  { %584 = vmatprep.subr.mxu1 %v272_v30 }
  0x46   :  { %585 = vmatpush3.msra.mxu1 %v272_v30 }
  0x47   :  { %586 = vmatprep.subr.mxu1 %v271_v31 }
  0x48   :  { %587 = vmatpush3.msra.mxu1 %v271_v31 }
  0x49   :  { %588 = vmatprep.subr.mxu1 %v270_v32 }
  0x4a   :  { %589 = vmatpush3.msra.mxu1 %v270_v32 }
  0xa4   :  { %v172_v21 = vpop.permute.xlu0 %171 }
  0xa8   :  { %v167_v24 = vpop.permute.xlu0 %166 }
  0xef   :  { %v550_v22 = vpop.f32.mrf.mxu0 }
  0xf0   :  { %v175_v23 = vmul.f32 %v550_v22, %v172_v21 }
  0xf1   :  { %v155_v25 = vpop.f32.mrf.mxu0 }
  0xf2   :  { %v174_v26 = vmul.f32 %v167_v24, %v155_v25  ;;  %551 = vmatprep.subr.mxu0 %v175_v23 }
  0xf3   :  { %552 = vmatpush3.msra.mxu0 %v175_v23 }
  0xf4   :  { %553 = vmatprep.subr.mxu0 %v174_v26 }
  0xf5   :  { %554 = vmatpush3.msra.mxu0 %v174_v26 }
  0xf6   :  { %556 = vmatmul.mubr.msk.f32.vlgmr.msra.gmra.mxu0 %vm176_vm1, %v72_v27 }
  0xf7   :  { %597 = vmatprep.mubr.msk.f32.mxu0 %vm176_vm1, %v71_v9 }
 0x1b6   :  { %v557_v33 = vpop.f32.mrf.mxu0 }
 0x1b7   :  { %v259_v34 = vmul.f32 %v557_v33, %v172_v21 }
 0x1b8   :  { %v249_v36 = vpop.f32.mrf.mxu0 }
 0x1b9   :  { %v258_v37 = vmul.f32 %v249_v36, %v167_v24  ;;  %v267_v38 = vadd.f32 %v504_v35, %v259_v34 }
 0x1bb   :  { %v266_v39 = vadd.f32 %v504_v35, %v258_v37  ;;  %v269_v41 = vmax.f32 %v267_v38, 0.0 }
 0x1bd   :  { %v268_v40 = vmax.f32 %v266_v39, 0.0 }
 0x1bf   :  { %590 = vmatprep.mubr.f32.mxu1 %v268_v40 }
 0x1c0   :  { %591 = vmatmul.mubr.f32.vlgmr.msra.gmra.mxu1 %v269_v41 }
 0x280   :  { %v592_v42 = vpop.f32.mrf.mxu1 }
 0x281   :  { %v363_v43 = vmul.f32 %v592_v42, %v172_v21 }
 0x282   :  { %v353_v44 = vpop.f32.mrf.mxu1 }
 0x283   :  { %v362_v45 = vmul.f32 %v353_v44, %v167_v24  ;;  %593 = vmatprep.subr.mxu0 %v363_v43 }
 0x284   :  { %594 = vmatpush3.msra.mxu0 %v363_v43 }
 0x285   :  { %595 = vmatprep.subr.mxu0 %v362_v45 }
 0x286   :  { %596 = vmatpush3.msra.mxu0 %v362_v45 }
 0x287   :  { %598 = vmatmul.mubr.msk.f32.vlgmr.msra.gmra.mxu0 %vm176_vm1, %v72_v27 }
 0x347   :  { %v599_v47 = vpop.f32.mrf.mxu0 }
 0x348   :  { %v440_v48 = vmul.f32 %v599_v47, %v172_v21 }
 0x349   :  { %v430_v49 = vpop.f32.mrf.mxu0 }
 0x34a   :  { %v448_v50 = vadd.f32 %v507_v46, %v440_v48  ;;  %v439_v51 = vmul.f32 %v430_v49, %v167_v24 }
 0x34c   :  { %450 = vst [vmem:[#allocation9 + $0x8] sm:$0xff] %v448_v50  ;;  %v447_v52 = vadd.f32 %v507_v46, %v439_v51 }
 0x34e   :  { %v451_v53 = vmax.f32 %v447_v52, %v448_v50  ;;  %v458_v54 = vadd.f32 %v448_v50, %v447_v52  ;;  %449 = vst [vmem:[#allocation9] sm:$0xff] %v447_v52 }
 0x34f   :  { %680 = shalt.err (!%p677_p5)
}
 0x350   :  { %489 = dma.vmem_to_hbm [thread:$0]  %s484_s29, 256, %s829_s8, [#allocation10], %s719_s10, %s719_s10, %s720_s11   ;;  %v452_v55 = vrot.slane %v451_v53, 4  ;;  %v459_v56 = vrot.slane %v458_v54, 4 }
 0x351   :  { %s724_s12 = smov [#allocation8]  }
 0x352   :  { %v453_v57 = vmax.f32 %v451_v53, %v452_v55  ;;  %v460_v58 = vadd.f32 %v459_v56, %v458_v54  ;;  %s474_s13 = sshll.u32 %s724_s12, 4  ;;  %s475_s13 = int_to_ptr.vmem [resolvable:$true] %s474_s13 }
 0x353   :  { %s689_s14 = scalar_lea.vmem %s475_s13, 16  ;;  %s693_s8 = scalar_lea.vmem %s475_s13, 32 }
 0x354   :  { %v454_v59 = vrot.slane %v453_v57, 2  ;;  %v461_v60 = vrot.slane %v460_v58, 2  ;;  %p690_p6 = scmp.ne.s32.totalorder %s475_s13, %s689_s14  ;;  %p694_p7 = scmp.lt.s32.totalorder %s475_s13, %s475_s13 }
 0x355   :  { %p695_p8 = scmp.lt.s32.totalorder %s693_s8, %s689_s14 }
 0x356   :  { %v455_v61 = vmax.f32 %v453_v57, %v454_v59  ;;  %v462_v62 = vadd.f32 %v461_v60, %v460_v58 }
 0x357   :  { %p696_p9 = por %p695_p8, %p694_p7 }
 0x358   :  { %v456_v63 = vrot.slane %v455_v61, 1  ;;  %v463_v0 = vrot.slane %v462_v62, 1 }
 0x359   :  { %p697_p10 = pnand %p696_p9, %p690_p6 }
 0x35a   :  { %v464_v1 = vadd.f32 %v463_v0, %v462_v62  ;;  %v457_v2 = vmax.f32 %v455_v61, %v456_v63 }
 0x35c   :  { %v465_v3 = vmul.f32 0.0625, %v464_v1 }
 0x35e   :  { %v466_v4 = vadd.f32 %v465_v3, %v457_v2 }
 0x360   :  { %467 = vst [vmem:[#allocation8] sm:$0x1] %v466_v4 }
 0x361   :  { %700 = shalt.err (!%p697_p10)
}
 0x362   :  { %477 = dma.vmem_to_hbm [thread:$0]  %s475_s13, 16, %s828_s7, [#allocation4]  }
 0x363   :  { %713 = dma.done.wait [#allocation4], 16  }
 0x364   :  { %714 = vsyncadd [#allocation4], 4294967280 }
 0x365   :  { %715 = dma.done.wait [#allocation10], 256  }
 0x366   :  { %716 = vsyncadd [#allocation10], 4294967040 }
 0x367   :  { %496 = vsyncpa [#allocation3], 1 }
 0x368   :  { %497 = vsyncpa [#allocation6], 1 }
 0x369   :  { %498 = vsyncpa [#allocation4], 1 }
 0x36a   :  { %499 = vsyncpa [#allocation10], 1 }

</bundles_post_ra>
